<compile_context>
chip_gen: v7x
topology: tpu7x:2x2x1
jax: 0.10.0
libtpu: 0.0.40
codegen_flags: <defaults>
</compile_context>

<pallas_src>
import jax
import jax.numpy as jnp
from jax.experimental import pallas as pl
from jax.experimental.pallas import tpu as pltpu

T_ROWS = 10   # rows of the constant prefix t = torch.ones(10, 20)
COLS = 20     # feature width


def _cat_relu_kernel(x_ref, tmpl_ref, out_ref, relu_buf, sem):
    """Write relu(x) into rows [T_ROWS, T_ROWS + bx) of the aliased output.

    `tmpl_ref` is the same HBM buffer as `out_ref` (input_output_aliases);
    its first T_ROWS rows already hold the constant 1.0 prefix
    (relu(1.0) == 1.0), so the kernel never regenerates or re-stores them.
    Only bx * COLS * 4 bytes are written back instead of the full output.
    """
    del tmpl_ref  # aliased with out_ref; rows [0, T_ROWS) are already correct
    bx = x_ref.shape[0]  # static at trace time
    relu_buf[...] = jnp.maximum(x_ref[...], 0.0)
    cp = pltpu.make_async_copy(relu_buf, out_ref.at[pl.ds(T_ROWS, bx), :], sem)
    cp.start()
    cp.wait()


def _cat_relu_call(x, out_buf):
    bx, cols = x.shape
    assert cols == COLS
    out_rows = T_ROWS + bx
    itemsize = jnp.dtype(x.dtype).itemsize
    return pl.pallas_call(
        _cat_relu_kernel,
        out_shape=jax.ShapeDtypeStruct((out_rows, COLS), x.dtype),
        # Gridless call: no pipeline prologue/epilogue, no double buffering.
        in_specs=[
            pl.BlockSpec(memory_space=pltpu.MemorySpace.VMEM),  # x (80 B) -> VMEM
            pl.BlockSpec(memory_space=pl.ANY),                  # template (aliased)
        ],
        out_specs=pl.BlockSpec(memory_space=pl.ANY),            # stays in HBM; manual DMA
        scratch_shapes=[
            pltpu.VMEM((bx, COLS), x.dtype),   # relu(x) staging tile
            pltpu.SemaphoreType.DMA,           # completion sem for the tiny writeback
        ],
        input_output_aliases={1: 0},           # out_buf IS the output buffer
        cost_estimate=pl.CostEstimate(
            flops=bx * COLS,                           # one max per input element
            transcendentals=0,
            bytes_accessed=2 * bx * COLS * itemsize,   # ~80 B in + ~80 B out
        ),
    )(x, out_buf)


@jax.jit
def model_forward(x):
    """relu(cat(ones(10, 20), x, dim=0)).view(10 + bx, -1)  ->  (10 + bx, 20)."""
    bx = x.shape[0]
    # Ones template built outside the kernel; the kernel only overwrites rows
    # [10, 10 + bx) and never touches the prefix.  In a hot loop, a caller can
    # hold this template and donate it (jax.jit(..., donate_argnums=...)) so
    # the ones prefix is written exactly once across all calls.
    out_buf = jnp.ones((T_ROWS + bx, COLS), dtype=x.dtype)
    return _cat_relu_call(x, out_buf)


def reference_forward(x):
    t = jnp.ones((T_ROWS, COLS), dtype=x.dtype)
    y = jnp.concatenate((t, x), axis=0)
    return jnp.maximum(y.reshape(y.shape[0], -1), 0.0)


if __name__ == "__main__":
    key = jax.random.PRNGKey(0)
    # The PyTorch spec uses x = torch.ones(1, 20); use random values of the
    # same shape so the relu path is actually exercised.
    x = jax.random.normal(key, (1, COLS), dtype=jnp.float32)

    out = jax.block_until_ready(model_forward(x))
    ref = reference_forward(x)

    assert out.shape == (T_ROWS + x.shape[0], COLS)
    assert out.dtype == x.dtype
    assert jnp.allclose(out, ref, atol=1e-6), "mismatch vs reference"

    print("KERNEL_OK")
</pallas_src>

<mosaic_0001>
module attributes {stable_mosaic.version = 11 : i64} {
  func.func @_cat_relu_kernel(%arg0: memref<1x20xf32, #tpu.memory_space<vmem>>, %arg1: memref<11x20xf32, #tpu.memory_space<any>>, %arg2: memref<11x20xf32, #tpu.memory_space<any>>, %arg3: memref<1x20xf32, #tpu.memory_space<vmem>>, %arg4: memref<!tpu.dma_semaphore, #tpu.memory_space<semaphore_mem>>) attributes {dimension_semantics = [], scalar_prefetch = 0 : i64, scratch_operands = 2 : i64, tpu.core_type = #tpu.core_type<tc>} {
    %c0 = arith.constant 0 : index
    %c0_0 = arith.constant 0 : index
    %0 = vector.load %arg0[%c0, %c0_0] : memref<1x20xf32, #tpu.memory_space<vmem>>, vector<1x20xf32>
    %cst = arith.constant 0.000000e+00 : f32
    %1 = vector.broadcast %cst : f32 to vector<1x20xf32>
    %2 = arith.maximumf %0, %1 : vector<1x20xf32>
    %c0_1 = arith.constant 0 : index
    %c0_2 = arith.constant 0 : index
    %3 = vector.load %arg3[%c0_1, %c0_2] : memref<1x20xf32, #tpu.memory_space<vmem>>, vector<1x20xf32>
    tpu.vector_store %arg3[%c0_1, %c0_2], %2 {strides = array<i32>} : memref<1x20xf32, #tpu.memory_space<vmem>>, vector<1x20xf32>,
    %c10_i32 = arith.constant 10 : i32
    %c0_i32 = arith.constant 0 : i32
    %4 = tpu.memref_slice %arg2[%c10_i32, %c0_i32] : memref<11x20xf32, #tpu.memory_space<any>> -> memref<1x20xf32, #tpu.memory_space<any>>
    tpu.enqueue_dma source(%arg3 : memref<1x20xf32, #tpu.memory_space<vmem>>) target(%4 : memref<1x20xf32, #tpu.memory_space<any>>) target_semaphore(%arg4 : memref<!tpu.dma_semaphore, #tpu.memory_space<semaphore_mem>>)
    %c10_i32_3 = arith.constant 10 : i32
    %c0_i32_4 = arith.constant 0 : i32
    %5 = tpu.memref_slice %arg2[%c10_i32_3, %c0_i32_4] : memref<11x20xf32, #tpu.memory_space<any>> -> memref<1x20xf32, #tpu.memory_space<any>>
    tpu.wait_dma2 semaphore(%arg4 : memref<!tpu.dma_semaphore, #tpu.memory_space<semaphore_mem>>) src(%arg3 : memref<1x20xf32, #tpu.memory_space<vmem>>) dst(%5 : memref<1x20xf32, #tpu.memory_space<any>>)
    return
  }
}

</mosaic_0001>

<bundles_post_ra>
// kernel: model_forward.1
= control target key start
LH: loop header
LB: loop body
LE: loop exit
PB: predicated region body
PF: predicated region fallthrough
CT: control target
= control target key end

     0   :  { %vm11_vm0 = vcmask 155648   ;;  %s63_s11 = smov [#allocation2]   ;;  %s94_s0 = inlined_call_operand.vmem [shape: f32[1,20], index: 0, kind: input, shape index: {}]   ;;  %s95_s1 = inlined_call_operand.hbm [shape: f32[11,20], index: 1, kind: input, shape index: {}, may-alias: {1,2}]   ;;  %s96_s2 = inlined_call_operand.hbm [shape: f32[11,20], index: 2, kind: output, shape index: {}, may-alias: {1,2}]  }
   0x1   :  { %v9_v0 = vld [vmem:[%s94_s0] sm:$0x1]  ;;  %s21_s12 = sshll.u32 %s63_s11, 4  ;;  %s13_s15 = scalar_lea.hbm %s96_s2, 160  ;;  %s22_s12 = int_to_ptr.vmem [resolvable:$true] %s21_s12 }
   0x2   :  { %v10_v1 = vmax.f32 %v9_v0, 0.0  ;;  %s36_s16 = scalar_lea.vmem %s22_s12, 16  ;;  %p41_p1 = scmp.lt.s32.totalorder %s22_s12, %s22_s12 }
   0x3   :  { %p37_p0 = scmp.ne.s32.totalorder %s22_s12, %s36_s16  ;;  %p42_p2 = scmp.lt.s32.totalorder %s36_s16, %s36_s16 }
   0x4   :  { %12 = vst.msk [vmem:[#allocation2] sm:$0x1] %vm11_vm0, %v10_v1 }
   0x5   :  { %p43_p3 = por %p42_p2, %p41_p1 }
   0x7   :  { %p44_p4 = pnand %p43_p3, %p37_p0 }
   0x9   :  { %47 = shalt.err (!%p44_p4)  }
   0xa   :  { %s60_s0 = scalar_lea.hbm %s96_s2, 176  ;;  %s50_s20 = scalar_lea.hbm %s96_s2, 256 }
   0xb   :  { %p49_p5 = scmp.ne.s32.totalorder %s13_s15, %s60_s0  ;;  %p51_p6 = scmp.lt.u32.totalorder %s13_s15, %s96_s2 }
   0xc   :  { %p52_p7 = scmp.lt.u32.totalorder %s50_s20, %s60_s0  ;;  %p54_p9 = scmp.lt.u32.totalorder %s60_s0, %s13_s15 }
   0xe   :  { %p53_p8 = por %p52_p7, %p51_p6 }
  0x10   :  { %p55_p10 = por %p54_p9, %p53_p8 }
  0x12   :  { %p56_p11 = pnand %p55_p10, %p49_p5 }
  0x14   :  { %59 = shalt.err (!%p56_p11)  }
  0x15   :  { %24 = dma.vmem_to_hbm [thread:$0]  %s22_s12, 16, %s13_s15, [#allocation3] }
  0x16   :  { %61 = dma.done.wait [#allocation3], 16 }
  0x17   :  { %62 = vsyncadd [#allocation3], 4294967280 }
  0x18   :  { %28 = vsyncmov [#allocation3] }
  0x1b   :  { %s29_s23 = vpop.sfrf %28 }
  0x1c   :  { %p34_p12 = scmp.ne.s32.totalorder %s29_s23, 0 }
  0x1e   :  { %33 = shalt.err (%p34_p12)  }

</bundles_post_ra>
